<compile_context>
chip_gen: v6e
topology: v6e:2x2x1
jax: 0.10.0
libtpu: 0.0.40
codegen_flags: <defaults>
</compile_context>

<pallas_src>
import jax
import jax.numpy as jnp
from jax.experimental import pallas as pl
from jax.experimental.pallas import tpu as pltpu

LANE = 128  # lane-dense padding target for every feature dimension


def softq_kernel(x_ref, w1_ref, b1_ref, w2_ref, b2_ref, w4_ref, b4_ref, out_ref):
    # One (tile_m, 128) row-tile per grid step; weights stay VMEM-resident.
    x = x_ref[...]                                                    # (tile_m, 128) f32

    h1 = jnp.tanh(jnp.dot(x, w1_ref[...],
                          preferred_element_type=jnp.float32) + b1_ref[...])
    h2 = jnp.tanh(jnp.dot(h1, w2_ref[...],
                          preferred_element_type=jnp.float32) + b2_ref[...])
    q = jnp.dot(h2, w4_ref[...],
                preferred_element_type=jnp.float32) + b4_ref[...]
    out_ref[...] = q                                                  # lane-dense f32 store


def _round_up(x, m):
    return -(-x // m) * m


def _choose_tile(batch):
    """Adaptive row tile: <=8 wasted rows for small batches, 512-1024 rows for
    large batches (amortizes per-step overhead), and >=2 grid steps whenever
    possible so v7x can shard the 'parallel' axis across its two TensorCores."""
    b8 = _round_up(batch, 8)
    if b8 <= 16:
        return b8
    return min(1024, _round_up(-(-b8 // 2), 8))


def _pad2(a, rows, cols):
    out = jnp.zeros((rows, cols), jnp.float32)
    return out.at[: a.shape[0], : a.shape[1]].set(a.astype(jnp.float32))


def prepare_params(params):
    """Zero-pad logical-shape params to (128, 128) / (1, 128), keep f32 for parity."""
    w1, b1, w2, b2, w4, b4 = params
    return (_pad2(w1, LANE, LANE), _pad2(b1, 1, LANE),
            _pad2(w2, LANE, LANE), _pad2(b2, 1, LANE),
            _pad2(w4, LANE, LANE), _pad2(b4, 1, LANE))


def softq_forward(state, packed_params, num_actions):
    """state: (batch, num_inputs) f32.  Returns (batch, num_actions) f32."""
    w1, b1, w2, b2, w4, b4 = packed_params
    batch, num_inputs = state.shape
    in_pad = w1.shape[0]
    out_pad = w4.shape[1]
    assert num_inputs <= in_pad, "num_inputs exceeds padded weight width"
    assert num_actions <= out_pad, "num_actions exceeds padded weight width"

    tile_m = _choose_tile(batch)
    batch_p = _round_up(batch, tile_m)

    # Pad batch rows + feature lanes.  allow_input_fusion lets XLA fuse this
    # producer into the pallas_call input instead of materializing it.
    x = jnp.zeros((batch_p, in_pad), jnp.float32).at[:batch, :num_inputs].set(state)

    grid = (batch_p // tile_m,)
    const = lambda shape: pl.BlockSpec(shape, lambda i: (0, 0))

    param_bytes = 4 * (w1.size + w2.size + w4.size + b1.size + b2.size + b4.size)
    cost = pl.CostEstimate(
        flops=2 * batch_p * (in_pad * LANE + LANE * LANE + LANE * out_pad),
        transcendentals=2 * batch_p * LANE,
        bytes_accessed=4 * batch_p * (in_pad + out_pad) + param_bytes,
    )

    out = pl.pallas_call(
        softq_kernel,
        out_shape=jax.ShapeDtypeStruct((batch_p, out_pad), jnp.float32),
        grid=grid,
        in_specs=[
            pl.BlockSpec((tile_m, in_pad), lambda i: (i, 0)),
            const(w1.shape), const(b1.shape),
            const(w2.shape), const(b2.shape),
            const(w4.shape), const(b4.shape),
        ],
        out_specs=pl.BlockSpec((tile_m, out_pad), lambda i: (i, 0)),
        compiler_params=pltpu.CompilerParams(
            dimension_semantics=("parallel",),
            allow_input_fusion=[True, False, False, False, False, False, False]),
        cost_estimate=cost,
    )(x, w1, b1, w2, b2, w4, b4)

    return out[:batch, :num_actions]


def init_params(key, num_inputs, num_actions, hidden_size, init_w=0.003):
    # Deterministic synthetic init mirroring the PyTorch module's parameter shapes.
    # linear1 / linear2: PyTorch default init (uniform +-1/sqrt(fan_in)).
    # linear4: uniform(-init_w, init_w) per the module __init__.
    k1, k2, k3, k4, k5, k6 = jax.random.split(key, 6)

    def lin_init(kw, kb, fan_in, fan_out):
        bound = 1.0 / jnp.sqrt(fan_in)
        w = jax.random.uniform(kw, (fan_in, fan_out), jnp.float32, -bound, bound)
        b = jax.random.uniform(kb, (1, fan_out), jnp.float32, -bound, bound)
        return w, b

    w1, b1 = lin_init(k1, k2, num_inputs, hidden_size)
    w2, b2 = lin_init(k3, k4, hidden_size, hidden_size)
    w4 = jax.random.uniform(k5, (hidden_size, num_actions), jnp.float32, -init_w, init_w)
    b4 = jax.random.uniform(k6, (1, num_actions), jnp.float32, -init_w, init_w)
    return (w1, b1, w2, b2, w4, b4)


def ref_forward(state, params):
    # Pure-JAX f32 reference == PyTorch forward math.
    w1, b1, w2, b2, w4, b4 = params
    h1 = jnp.tanh(state @ w1 + b1)
    h2 = jnp.tanh(h1 @ w2 + b2)
    return h2 @ w4 + b4


if __name__ == "__main__":
    key = jax.random.PRNGKey(0)

    num_inputs = 43     # matches `state = np.zeros(shape=43)` in the source file
    num_actions = 4
    hidden_size = 32

    kx, kp = jax.random.split(key)
    params = init_params(kp, num_inputs, num_actions, hidden_size)
    packed = prepare_params(params)

    # Medium batch (non-multiple of 8*tile granularity): exercises the adaptive
    # 2-step grid (104-row tiles, 8 padded rows) used for v7x dual-TC sharding.
    batch = 200
    state = jax.random.normal(kx, (batch, num_inputs), jnp.float32)
    out = jax.block_until_ready(softq_forward(state, packed, num_actions))
    assert out.shape == (batch, num_actions)
    ref = ref_forward(state, params)
    assert jnp.allclose(out, ref, atol=1e-4, rtol=1e-4), "mismatch vs f32 reference (batch=200)"

    # Small inference-style batch: exercises the small-batch tile path (single
    # 8-row tile instead of padding to 128 rows).
    batch_s = 4
    state_s = jax.random.normal(jax.random.PRNGKey(1), (batch_s, num_inputs), jnp.float32)
    out_s = jax.block_until_ready(softq_forward(state_s, packed, num_actions))
    assert out_s.shape == (batch_s, num_actions)
    ref_s = ref_forward(state_s, params)
    assert jnp.allclose(out_s, ref_s, atol=1e-4, rtol=1e-4), "mismatch vs f32 reference (batch=4)"

    print("KERNEL_OK")
</pallas_src>

<mosaic_0001>
module attributes {stable_mosaic.version = 11 : i64} {
  func.func @softq_kernel(%arg0: i32, %arg1: memref<104x128xf32, #tpu.memory_space<vmem>>, %arg2: memref<128x128xf32, #tpu.memory_space<vmem>>, %arg3: memref<1x128xf32, #tpu.memory_space<vmem>>, %arg4: memref<128x128xf32, #tpu.memory_space<vmem>>, %arg5: memref<1x128xf32, #tpu.memory_space<vmem>>, %arg6: memref<128x128xf32, #tpu.memory_space<vmem>>, %arg7: memref<1x128xf32, #tpu.memory_space<vmem>>, %arg8: memref<104x128xf32, #tpu.memory_space<vmem>>) attributes {dimension_semantics = [#tpu.dimension_semantics<parallel>], iteration_bounds = array<i64: 2>, scalar_prefetch = 0 : i64, scratch_operands = 0 : i64, tpu.core_type = #tpu.core_type<tc>, window_params = [{transform_indices = @transform_0, window_bounds = array<i64: 104, 128>}, {pipeline_mode = #tpu.pipeline_mode<synchronous>, transform_indices = @transform_1, window_bounds = array<i64: 128, 128>}, {pipeline_mode = #tpu.pipeline_mode<synchronous>, transform_indices = @transform_2, window_bounds = array<i64: 1, 128>}, {pipeline_mode = #tpu.pipeline_mode<synchronous>, transform_indices = @transform_3, window_bounds = array<i64: 128, 128>}, {pipeline_mode = #tpu.pipeline_mode<synchronous>, transform_indices = @transform_4, window_bounds = array<i64: 1, 128>}, {pipeline_mode = #tpu.pipeline_mode<synchronous>, transform_indices = @transform_5, window_bounds = array<i64: 128, 128>}, {pipeline_mode = #tpu.pipeline_mode<synchronous>, transform_indices = @transform_6, window_bounds = array<i64: 1, 128>}, {transform_indices = @transform_7, window_bounds = array<i64: 104, 128>}]} {
    %c0 = arith.constant 0 : index
    %c0_0 = arith.constant 0 : index
    %0 = vector.load %arg1[%c0, %c0_0] : memref<104x128xf32, #tpu.memory_space<vmem>>, vector<104x128xf32>
    %c0_1 = arith.constant 0 : index
    %c0_2 = arith.constant 0 : index
    %1 = vector.load %arg2[%c0_1, %c0_2] : memref<128x128xf32, #tpu.memory_space<vmem>>, vector<128x128xf32>
    %cst = arith.constant dense<0.000000e+00> : vector<104x128xf32>
    %2 = tpu.matmul %0, %1, %cst {dimension_numbers = #tpu.dot_dimension_numbers<[1], [0], [0], [1], [0, 0, 1, 1], [], []>} : vector<104x128xf32>, vector<128x128xf32>, vector<104x128xf32> -> vector<104x128xf32>
    %c0_3 = arith.constant 0 : index
    %c0_4 = arith.constant 0 : index
    %3 = vector.load %arg3[%c0_3, %c0_4] : memref<1x128xf32, #tpu.memory_space<vmem>>, vector<1x128xf32>
    %4 = vector.broadcast %3 : vector<1x128xf32> to vector<104x128xf32>
    %5 = arith.addf %2, %4 : vector<104x128xf32>
    %6 = math.tanh %5 : vector<104x128xf32>
    %c0_5 = arith.constant 0 : index
    %c0_6 = arith.constant 0 : index
    %7 = vector.load %arg4[%c0_5, %c0_6] : memref<128x128xf32, #tpu.memory_space<vmem>>, vector<128x128xf32>
    %cst_7 = arith.constant dense<0.000000e+00> : vector<104x128xf32>
    %8 = tpu.matmul %6, %7, %cst_7 {dimension_numbers = #tpu.dot_dimension_numbers<[1], [0], [0], [1], [0, 0, 1, 1], [], []>} : vector<104x128xf32>, vector<128x128xf32>, vector<104x128xf32> -> vector<104x128xf32>
    %c0_8 = arith.constant 0 : index
    %c0_9 = arith.constant 0 : index
    %9 = vector.load %arg5[%c0_8, %c0_9] : memref<1x128xf32, #tpu.memory_space<vmem>>, vector<1x128xf32>
    %10 = vector.broadcast %9 : vector<1x128xf32> to vector<104x128xf32>
    %11 = arith.addf %8, %10 : vector<104x128xf32>
    %12 = math.tanh %11 : vector<104x128xf32>
    %c0_10 = arith.constant 0 : index
    %c0_11 = arith.constant 0 : index
    %13 = vector.load %arg6[%c0_10, %c0_11] : memref<128x128xf32, #tpu.memory_space<vmem>>, vector<128x128xf32>
    %cst_12 = arith.constant dense<0.000000e+00> : vector<104x128xf32>
    %14 = tpu.matmul %12, %13, %cst_12 {dimension_numbers = #tpu.dot_dimension_numbers<[1], [0], [0], [1], [0, 0, 1, 1], [], []>} : vector<104x128xf32>, vector<128x128xf32>, vector<104x128xf32> -> vector<104x128xf32>
    %c0_13 = arith.constant 0 : index
    %c0_14 = arith.constant 0 : index
    %15 = vector.load %arg7[%c0_13, %c0_14] : memref<1x128xf32, #tpu.memory_space<vmem>>, vector<1x128xf32>
    %16 = vector.broadcast %15 : vector<1x128xf32> to vector<104x128xf32>
    %17 = arith.addf %14, %16 : vector<104x128xf32>
    %c0_15 = arith.constant 0 : index
    %c0_16 = arith.constant 0 : index
    %18 = vector.load %arg8[%c0_15, %c0_16] : memref<104x128xf32, #tpu.memory_space<vmem>>, vector<104x128xf32>
    tpu.vector_store %arg8[%c0_15, %c0_16], %17 {strides = array<i32>} : memref<104x128xf32, #tpu.memory_space<vmem>>, vector<104x128xf32>,
    return
  }
  func.func @transform_0(%arg0: i32) -> (i32, i32) {
    %c0_i32 = arith.constant 0 : i32
    %c0_i32_0 = arith.constant 0 : i32
    return %arg0, %c0_i32 : i32, i32
  }
  func.func @transform_1(%arg0: i32) -> (i32, i32) {
    %c0_i32 = arith.constant 0 : i32
    %c0_i32_0 = arith.constant 0 : i32
    %c0_i32_1 = arith.constant 0 : i32
    return %c0_i32, %c0_i32_0 : i32, i32
  }
  func.func @transform_2(%arg0: i32) -> (i32, i32) {
    %c0_i32 = arith.constant 0 : i32
    %c0_i32_0 = arith.constant 0 : i32
    %c0_i32_1 = arith.constant 0 : i32
    return %c0_i32, %c0_i32_0 : i32, i32
  }
  func.func @transform_3(%arg0: i32) -> (i32, i32) {
    %c0_i32 = arith.constant 0 : i32
    %c0_i32_0 = arith.constant 0 : i32
    %c0_i32_1 = arith.constant 0 : i32
    return %c0_i32, %c0_i32_0 : i32, i32
  }
  func.func @transform_4(%arg0: i32) -> (i32, i32) {
    %c0_i32 = arith.constant 0 : i32
    %c0_i32_0 = arith.constant 0 : i32
    %c0_i32_1 = arith.constant 0 : i32
    return %c0_i32, %c0_i32_0 : i32, i32
  }
  func.func @transform_5(%arg0: i32) -> (i32, i32) {
    %c0_i32 = arith.constant 0 : i32
    %c0_i32_0 = arith.constant 0 : i32
    %c0_i32_1 = arith.constant 0 : i32
    return %c0_i32, %c0_i32_0 : i32, i32
  }
  func.func @transform_6(%arg0: i32) -> (i32, i32) {
    %c0_i32 = arith.constant 0 : i32
    %c0_i32_0 = arith.constant 0 : i32
    %c0_i32_1 = arith.constant 0 : i32
    return %c0_i32, %c0_i32_0 : i32, i32
  }
  func.func @transform_7(%arg0: i32) -> (i32, i32) {
    %c0_i32 = arith.constant 0 : i32
    %c0_i32_0 = arith.constant 0 : i32
    return %arg0, %c0_i32 : i32, i32
  }
}

</mosaic_0001>

<bundles_post_ra>
// kernel: tpu_custom_call.1
= control target key start
LH: loop header
LB: loop body
LE: loop exit
PB: predicated region body
PF: predicated region fallthrough
CT: control target
= control target key end

     0   :  { %s2117_s0 = inlined_call_operand.hbm [shape: f32[208,128], index: 0, kind: input, shape index: {}]   ;;  %s2118_s1 = inlined_call_operand.hbm [shape: f32[128,128], index: 1, kind: input, shape index: {}]   ;;  %s2119_s2 = inlined_call_operand.vmem [shape: f32[1,128], index: 2, kind: input, shape index: {}]   ;;  %s2120_s3 = inlined_call_operand.hbm [shape: f32[128,128], index: 3, kind: input, shape index: {}]   ;;  %s2121_s4 = inlined_call_operand.vmem [shape: f32[1,128], index: 4, kind: input, shape index: {}]   ;;  %s2122_s5 = inlined_call_operand.hbm [shape: f32[128,128], index: 5, kind: input, shape index: {}]   ;;  %s2123_s6 = inlined_call_operand.vmem [shape: f32[1,128], index: 6, kind: input, shape index: {}]   ;;  %s2124_s7 = inlined_call_operand.hbm [shape: f32[208,128], index: 7, kind: output, shape index: {}]  }
   0x1   :  { %2131 = sst [smem:[#allocation15_spill]] %s2118_s1 }
   0x2   :  { %12 = vsyncpa [#allocation3], 0 }
   0x3   :  { %14 = vsyncpa [#allocation3 + $0x1], 0 }
   0x4   :  { %15 = vsyncpa [#allocation6], 0 }
   0x5   :  { %16 = vsyncpa [#allocation9], 0 }
   0x6   :  { %17 = vsyncpa [#allocation4], 0 }
   0x7   :  { %19 = vsyncpa [#allocation4 + $0x1], 0  ;;  %s1689_s24 = smov 0   ;;  %s1691_s25 = smov 0  }
   0x8   :  { %s1693_s26 = smov 0   ;;  %s1695_s27 = smov 0  }
   0x9 LB: > { %s1710_s28 = sadd.s32 4294967295, %s1636_s27   ;;  %s970_s29 = sadd.s32 4294967294, %s1636_s27   ;;  %s1636_s27 = sphi %s1695_s27, %s2153_s27   ;;  %s1632_s26 = sphi %s1693_s26, %s2152_s26   ;;  %s1628_s25 = sphi %s1691_s25, %s2151_s25   ;;  %s1624_s24 = sphi %s1689_s24, %s2150_s24  }
   0xa   : > { %p45_p0 = scmp.ne.s32.totalorder %s1628_s25, %s1624_s24  ;;  %p2125_p1 = scmp.eq.s32.totalorder %s1710_s28, 0 }
   0xb   : > { %p195_p2 = scmp.eq.s32.totalorder %s1710_s28, 1  ;;  %p201_p3 = scmp.eq.s32.totalorder %s970_s29, 1 }
   0xc   : > { %p1719_p4 = por %p2125_p1, %p45_p0  ;;  %p971_p5 = scmp.ge.s32.totalorder %s1636_s27, 1 }
   0xd   : > { %p1724_p6 = por %p201_p3, %p45_p0  ;;  %p208_p7 = scmp.lt.s32.totalorder %s1636_s27, 3 }
   0xe   : > { %s2132_s30 = scalar_select %p1719_p4, 1, 0 }
   0xf   : > { %s2133_s8 = scalar_select %p1724_p6, 1, 0 }
  0x10   : > { %p1729_p8 = pnand %p971_p5, %p208_p7  ;;  %s1638_s10 = smov [#allocation5]  }
  0x11   : > { %s220_s11 = sshll.u32 %s1638_s10, 4  ;;  %s1639_s13 = smov [#allocation7]   ;;  %s221_s11 = int_to_ptr.vmem [resolvable:$true] %s220_s11 }
  0x12   : > { %s2134_s9 = scalar_select %p1729_p8, 1, 0 }
  0x13   : > { %p1339_p9 = pneg %p1729_p8  ;;  %s236_s14 = sshll.u32 %s1639_s13, 4  ;;  %s237_s14 = int_to_ptr.vmem [resolvable:$true] %s236_s14 }
  0x14   : > { %s1640_s15 = smov [#allocation8]   ;;  %s1469_s17 = scalar_lea.vmem %s221_s11, 2048 }
  0x15   : > { %p1738_p11 = pnand %p1339_p9, %p2125_p1  ;;  %s252_s16 = sshll.u32 %s1640_s15, 4  ;;  %s253_s16 = int_to_ptr.vmem [resolvable:$true] %s252_s16 }
  0x16   : > { %p1470_p13 = scmp.ne.s32.totalorder %s221_s11, %s1469_s17  ;;  %p1477_p5 = scmp.lt.s32.totalorder %s221_s11, %s221_s11 }
  0x17   : > { %p1460_p12 = pneg %p1738_p11  ;;  %p1478_p7 = scmp.lt.s32.totalorder %s1469_s17, %s1469_s17 }
  0x19   : > { %p1472_p0 = pnand %p1470_p13, %p1460_p12  ;;  %p1479_p9 = por %p1478_p7, %p1477_p5 }
  0x1b   : > { %p1473_p3 = pneg %p1472_p0 }
  0x1d   : > { %p1480_p10 = pnand %p1479_p9, %p1473_p3 }
  0x1f   : > { %1483 = shalt.err (!%p1480_p10)
}
  0x20   : > { %s2126_s18 = smov 128   ;;  %s2127_s19 = smov 8  }
  0x21   : > { %s2136_s1 = sld [smem:[#allocation15_spill]]  ;;  %s1495_s22 = scalar_lea.vmem %s237_s14, 2048 }
  0x22   : > { %p1496_p13 = scmp.ne.s32.totalorder %s237_s14, %s1495_s22  ;;  %p1503_p3 = scmp.lt.s32.totalorder %s237_s14, %s237_s14 }
  0x23   : > { %p1504_p10 = scmp.lt.s32.totalorder %s1495_s22, %s1495_s22 }
  0x24   : > { %p1498_p0 = pnand %p1496_p13, %p1460_p12 }
  0x25   : > { %p1505_p7 = por %p1504_p10, %p1503_p3 }
  0x26   : > { %p1499_p5 = pneg %p1498_p0 }
  0x27   : > { %1342 = dma.hbm_to_vmem [thread:$0]  (!%p1738_p11), %s2136_s1, 2048, %s221_s11, [#allocation6], %s2126_s18, %s2126_s18, %s2127_s19  }
  0x28   : > { %p1506_p9 = pnand %p1505_p7, %p1499_p5 }
  0x2a   : > { %1509 = shalt.err (!%p1506_p9)
}
  0x2b   : > { %1345 = dma.hbm_to_vmem [thread:$0]  (!%p1738_p11), %s2120_s3, 2048, %s237_s14, [#allocation6], %s2126_s18, %s2126_s18, %s2127_s19  }
  0x2c   : > { %s1521_s10 = scalar_lea.vmem %s253_s16, 2048  ;;  %p1529_p3 = scmp.lt.s32.totalorder %s253_s16, %s253_s16 }
  0x2d   : > { %p1522_p1 = scmp.ne.s32.totalorder %s253_s16, %s1521_s10  ;;  %p1530_p5 = scmp.lt.s32.totalorder %s1521_s10, %s1521_s10 }
  0x2f   : > { %p1524_p13 = pnand %p1522_p1, %p1460_p12  ;;  %p1531_p10 = por %p1530_p5, %p1529_p3 }
  0x31   : > { %p1525_p0 = pneg %p1524_p13 }
  0x33   : > { %p1532_p7 = pnand %p1531_p10, %p1525_p0 }
  0x35   : > { %1535 = shalt.err (!%p1532_p7)
}
  0x36   : > { %1348 = dma.hbm_to_vmem [thread:$0]  (!%p1738_p11), %s2122_s5, 2048, %s253_s16, [#allocation9], %s2126_s18, %s2126_s18, %s2127_s19  }
  0x37   : > { %s1778_s14 = sadd.s32 1, %s1636_s27   ;;  %s32_s15 = sadd.s32 1, %s1632_s26 }
  0x38   : > { %s29_s12 = ssub.s32 %s1636_s27, %s1778_s14  ;;  %p39_p12 = scmp.ne.s32.totalorder %s1632_s26, %s1628_s25 }
  0x39   : > { %p30_p1 = scmp.eq.s32.totalorder %s29_s12, 0  ;;  %p40_p9 = scmp.eq.s32.totalorder %s1636_s27, 0 }
  0x3a   : > { %p1360_p13 = scmp.lt.s32.totalorder %s1636_s27, 2  ;;  %p1792_p3 = por %p195_p2, %p39_p12 }
  0x3b   : > { %s1788_s17 = scalar_select %p30_p1, %s1632_s26, %s32_s15  }
  0x3c   : > { %p41_p0 = por %p40_p9, %p39_p12  ;;  %s269_s21 = sand.u32 1, %s1632_s26  }
  0x3d   : > { %s2137_s20 = scalar_select %p1792_p3, 1, 0 }
  0x3e   : > { %s987_s22 = smul.u32 1664, %s1636_s27  ;;  %p1798_p11 = pnand %p1360_p13, %p41_p0 }
  0x3f   : > { %s1321_s16 = smul.u32 104, %s269_s21  ;;  %s1809_s15 = scalar_lea.sflag [#allocation3], %s269_s21 }
  0x40   : > { %s1805_s11 = scalar_lea.hbm %s2117_s0, %s987_s22  ;;  %p1538_p5 = pneg %p1798_p11 }
  0x41   : > { %s273_s13 = scalar_lea.vmem [#allocation2], %s1321_s16  ;;  %s1536_s18 = scalar_lea.hbm %s1805_s11, 1664 }
  0x42   : > { %s280_s12 = sshll.u32 %s273_s13, 4  ;;  %p1537_p2 = scmp.ne.s32.totalorder %s1805_s11, %s1536_s18  ;;  %s1807_s12 = int_to_ptr.vmem [resolvable:$true] %s280_s12 }
  0x43   : > { %s1541_s22 = scalar_lea.hbm %s2117_s0, 3328  ;;  %p1542_p1 = scmp.lt.s32.totalorder %s1805_s11, %s2117_s0 }
  0x44   : > { %p1539_p10 = pnand %p1538_p5, %p1537_p2  ;;  %p1543_p12 = scmp.lt.s32.totalorder %s1541_s22, %s1536_s18 }
  0x46   : > { %p1540_p7 = pneg %p1539_p10  ;;  %p1544_p9 = por %p1543_p12, %p1542_p1 }
  0x48   : > { %p1545_p13 = pnand %p1544_p9, %p1540_p7 }
  0x4a   : > { %1548 = shalt.err (!%p1545_p13)
}
  0x4b   : > { %s1549_s21 = scalar_lea.vmem %s1807_s12, 1664  ;;  %s1643_s16 = smov [#allocation2]  }
  0x4c   : > { %p1550_p0 = scmp.ne.s32.totalorder %s1807_s12, %s1549_s21  ;;  %s1554_s13 = sshll.u32 %s1643_s16, 4  ;;  %s1555_s13 = int_to_ptr.vmem [resolvable:$false] %s1554_s13 }
  0x4d   : > { %s1556_s19 = scalar_lea.vmem %s1555_s13, 3328  ;;  %p1557_p10 = scmp.lt.s32.totalorder %s1807_s12, %s1555_s13 }
  0x4e   : > { %p1552_p6 = pnand %p1550_p0, %p1538_p5  ;;  %p1558_p3 = scmp.lt.s32.totalorder %s1556_s19, %s1549_s21 }
  0x50   : > { %p1553_p2 = pneg %p1552_p6  ;;  %p1559_p4 = por %p1558_p3, %p1557_p10 }
  0x52   : > { %p1560_p8 = pnand %p1559_p4, %p1553_p2 }
  0x54   : > { %1563 = shalt.err (!%p1560_p8)
}
  0x55   : > { %s2139_s1 = smov 8   ;;  %s2140_s18 = smov 128  }
  0x56   : > { %1352 = dma.hbm_to_vmem [thread:$0]  (!%p1798_p11), %s1805_s11, 1664, %s1807_s12, %s1809_s15, %s2140_s18, %s2140_s18, %s2139_s1  }
  0x57   : > { %p2141_p6 = scmp.ne.s32.totalorder %s2134_s9, 0 }
  0x58   : > { %s1836_s29 = sand.u32 (!%p2141_p6), 1, %s1628_s25   ;;  %p2142_p4 = scmp.ne.s32.totalorder (!%p2141_p6), %s2132_s30, 0 }
  0x59   : > { %292 = sbr.rel (%p2141_p6) target bundleno = 811 (0x32b), region = 48  ;;  %s295_s10 = scalar_lea.sflag (!%p2141_p6), [#allocation3], %s1836_s29 }
  0x5a   : > { %s1322_s22 = smul.u32 (!%p2141_p6), 104, %s1836_s29 }
  0x5c   : > { %s1842_s23 = scalar_lea.vmem (!%p2141_p6), [#allocation2], %s1322_s22 }
  0x5e   : > { %1607 = dma.done.wait (%p2142_p4), %s295_s10, 1664  }
  0x5f   : > { %1609 = vsyncadd (%p2142_p4), %s295_s10, 4294965632  ;;  %p2143_p8 = scmp.eq.s32.totalorder %s1710_s28, 0 }
  0x61   : > { %1611 = dma.done.wait (%p2143_p8), [#allocation6], 4096   ;;  %p2144_p3 = pmov %p2143_p8 }
  0x63   : > { %1613 = vsyncadd (%p2144_p3), [#allocation6], 4294963200  ;;  %p2145_p11 = pmov %p2144_p3 }
  0x64   : > { %p2146_p5 = pmov %p2144_p3 }
  0x65   : > { %1615 = dma.done.wait (%p2145_p11), [#allocation9], 2048  }
  0x66   : > { %1617 = vsyncadd (%p2146_p5), [#allocation9], 4294965248  ;;  %v1644_v0 = vmov 0.0   ;;  %vm1645_vm0 = vmmov 0   ;;  %v371_v1 = vld [vmem:[#allocation5 + $0x78] sm:$0xff]  ;;  %v370_v2 = vld [vmem:[#allocation5 + $0x70] sm:$0xff] }
  0x67   : > { %1076 = vmatprep.subr.mxu0 %v1644_v0  ;;  %1108 = vmatprep.mubr.msk.f32.mxu0 %vm1645_vm0, %v1644_v0  ;;  %v369_v3 = vld [vmem:[#allocation5 + $0x68] sm:$0xff]  ;;  %v368_v4 = vld [vmem:[#allocation5 + $0x60] sm:$0xff]  ;;  %v367_v5 = vld [vmem:[#allocation5 + $0x58] sm:$0xff]  ;;  %s2052_s16 = scalar_lea.vmem [#allocation10], %s1322_s22  ;;  %s988_s13 = smul.u32 1664, %s1710_s28 }
  0x68   : > { %1147 = vmatprep.subr.mxu1 %v1644_v0  ;;  %1179 = vmatprep.mubr.msk.f32.mxu1 %vm1645_vm0, %v1644_v0  ;;  %v366_v6 = vld [vmem:[#allocation5 + $0x50] sm:$0xff]  ;;  %v537_v7 = vld [vmem:[#allocation7 + $0x78] sm:$0xff]  ;;  %v365_v8 = vld [vmem:[#allocation5 + $0x48] sm:$0xff]  ;;  %s868_s19 = sshll.u32 %s2052_s16, 4  ;;  %s855_s10 = scalar_lea.sflag [#allocation4], %s1836_s29  ;;  %s2073_s19 = int_to_ptr.vmem [resolvable:$true] %s868_s19 }
  0x69   : > { %1077 = vmatpush3.msra.mxu0 %v371_v1  ;;  %1148 = vmatpush3.msra.mxu1 %v537_v7  ;;  %v536_v9 = vld [vmem:[#allocation7 + $0x70] sm:$0xff]  ;;  %v535_v10 = vld [vmem:[#allocation7 + $0x68] sm:$0xff]  ;;  %v364_v11 = vld [vmem:[#allocation5 + $0x40] sm:$0xff]  ;;  %s2071_s22 = scalar_lea.hbm %s2124_s7, %s988_s13  ;;  %s1564_s28 = scalar_lea.vmem %s2073_s19, 1664 }
  0x6a   : > { %1078 = vmatprep.subr.mxu0 %v1644_v0  ;;  %1149 = vmatprep.subr.mxu1 %v1644_v0  ;;  %v534_v12 = vld [vmem:[#allocation7 + $0x60] sm:$0xff]  ;;  %v363_v13 = vld [vmem:[#allocation5 + $0x38] sm:$0xff]  ;;  %v362_v15 = vld [vmem:[#allocation5 + $0x30] sm:$0xff]  ;;  %p1565_p7 = scmp.ne.s32.totalorder %s2073_s19, %s1564_s28  ;;  %p2147_p1 = scmp.ne.s32.totalorder %s2137_s20, 0 }
  0x6b   : > { %1079 = vmatpush3.msra.mxu0 %v370_v2  ;;  %1150 = vmatpush3.msra.mxu1 %v536_v9  ;;  %v533_v14 = vld [vmem:[#allocation7 + $0x58] sm:$0xff]  ;;  %v532_v16 = vld [vmem:[#allocation7 + $0x50] sm:$0xff]  ;;  %v361_v17 = vld [vmem:[#allocation5 + $0x28] sm:$0xff] }
  0x6c   : > { %1080 = vmatprep.subr.mxu0 %v1644_v0  ;;  %1151 = vmatprep.subr.mxu1 %v1644_v0  ;;  %v531_v18 = vld [vmem:[#allocation7 + $0x48] sm:$0xff]  ;;  %v360_v19 = vld [vmem:[#allocation5 + $0x20] sm:$0xff]  ;;  %v359_v20 = vld [vmem:[#allocation5 + $0x18] sm:$0xff]  ;;  %p1566_p12 = pnand %p1565_p7, %p2147_p1 }
  0x6d   : > { %1081 = vmatpush3.msra.mxu0 %v369_v3  ;;  %1152 = vmatpush3.msra.mxu1 %v535_v10  ;;  %v358_v21 = vld [vmem:[#allocation5 + $0x10] sm:$0xff]  ;;  %v357_v22 = vld [vmem:[#allocation5 + $0x8] sm:$0xff]  ;;  %v356_v23 = vld [vmem:[#allocation5] sm:$0xff] }
  0x6e   : > { %1082 = vmatprep.subr.mxu0 %v1644_v0  ;;  %1153 = vmatprep.subr.mxu1 %v1644_v0  ;;  %v343_v24 = vld [vmem:[%s1842_s23] sm:$0xff]  ;;  %v344_v25 = vld [vmem:[%s1842_s23 + $0x8] sm:$0xff]  ;;  %v345_v26 = vld [vmem:[%s1842_s23 + $0x10] sm:$0xff]  ;;  %p1567_p9 = pneg %p1566_p12 }
  0x6f   : > { %1083 = vmatpush3.msra.mxu0 %v368_v4  ;;  %1154 = vmatpush3.msra.mxu1 %v534_v12  ;;  %v346_v27 = vld [vmem:[%s1842_s23 + $0x18] sm:$0xff]  ;;  %v347_v28 = vld [vmem:[%s1842_s23 + $0x20] sm:$0xff]  ;;  %v348_v29 = vld [vmem:[%s1842_s23 + $0x28] sm:$0xff] }
  0x70   : > { %1084 = vmatprep.subr.mxu0 %v1644_v0  ;;  %1155 = vmatprep.subr.mxu1 %v1644_v0  ;;  %v349_v30 = vld [vmem:[%s1842_s23 + $0x30] sm:$0xff]  ;;  %v350_v31 = vld [vmem:[%s1842_s23 + $0x38] sm:$0xff]  ;;  %v351_v32 = vld [vmem:[%s1842_s23 + $0x40] sm:$0xff] }
  0x71   : > { %1085 = vmatpush3.msra.mxu0 %v367_v5  ;;  %1156 = vmatpush3.msra.mxu1 %v533_v14  ;;  %v352_v33 = vld [vmem:[%s1842_s23 + $0x48] sm:$0xff]  ;;  %v353_v34 = vld [vmem:[%s1842_s23 + $0x50] sm:$0xff]  ;;  %v354_v35 = vld [vmem:[%s1842_s23 + $0x58] sm:$0xff] }
  0x72   : > { %1086 = vmatprep.subr.mxu0 %v1644_v0  ;;  %1157 = vmatprep.subr.mxu1 %v1644_v0  ;;  %v355_v36 = vld [vmem:[%s1842_s23 + $0x60] sm:$0xff]  ;;  %v530_v37 = vld [vmem:[#allocation7 + $0x40] sm:$0xff]  ;;  %v527_v40 = vld [vmem:[#allocation7 + $0x28] sm:$0xff]  ;;  %s1646_s23 = smov [#allocation10]  }
  0x73   : > { %1087 = vmatpush3.msra.mxu0 %v366_v6  ;;  %1158 = vmatpush3.msra.mxu1 %v532_v16  ;;  %v529_v38 = vld [vmem:[#allocation7 + $0x38] sm:$0xff]  ;;  %v528_v39 = vld [vmem:[#allocation7 + $0x30] sm:$0xff]  ;;  %v526_v41 = vld [vmem:[#allocation7 + $0x20] sm:$0xff]  ;;  %s1568_s30 = sshll.u32 %s1646_s23, 4  ;;  %s1569_s30 = int_to_ptr.vmem [resolvable:$false] %s1568_s30 }
  0x74   : > { %1088 = vmatprep.subr.mxu0 %v1644_v0  ;;  %1159 = vmatprep.subr.mxu1 %v1644_v0  ;;  %v525_v42 = vld [vmem:[#allocation7 + $0x18] sm:$0xff]  ;;  %v524_v43 = vld [vmem:[#allocation7 + $0x10] sm:$0xff]  ;;  %v523_v44 = vld [vmem:[#allocation7 + $0x8] sm:$0xff]  ;;  %s1570_s9 = scalar_lea.vmem %s1569_s30, 3328  ;;  %p1571_p13 = scmp.lt.s32.totalorder %s2073_s19, %s1569_s30 }
  0x75   : > { %1089 = vmatpush3.msra.mxu0 %v365_v8  ;;  %1160 = vmatpush3.msra.mxu1 %v531_v18  ;;  %v522_v45 = vld [vmem:[#allocation7] sm:$0xff]  ;;  %v703_v46 = vld [vmem:[#allocation8 + $0x78] sm:$0xff]  ;;  %v702_v47 = vld [vmem:[#allocation8 + $0x70] sm:$0xff]  ;;  %p1572_p0 = scmp.lt.s32.totalorder %s1570_s9, %s1564_s28 }
  0x76   : > { %1090 = vmatprep.subr.mxu0 %v1644_v0  ;;  %1161 = vmatprep.subr.mxu1 %v1644_v0  ;;  %v701_v48 = vld [vmem:[#allocation8 + $0x68] sm:$0xff]  ;;  %v700_v49 = vld [vmem:[#allocation8 + $0x60] sm:$0xff]  ;;  %v699_v50 = vld [vmem:[#allocation8 + $0x58] sm:$0xff] }
  0x77   : > { %1091 = vmatpush3.msra.mxu0 %v364_v11  ;;  %1162 = vmatpush3.msra.mxu1 %v530_v37  ;;  %v698_v51 = vld [vmem:[#allocation8 + $0x50] sm:$0xff]  ;;  %v697_v52 = vld [vmem:[#allocation8 + $0x48] sm:$0xff]  ;;  %p1573_p2 = por %p1572_p0, %p1571_p13 }
  0x78   : > { %1092 = vmatprep.subr.mxu0 %v1644_v0  ;;  %1163 = vmatprep.subr.mxu1 %v1644_v0  ;;  %v1943_v53 = vld [vmem:[%s2119_s2] ss:$0 sm:$0xff] }
  0x79   : > { %1093 = vmatpush3.msra.mxu0 %v363_v13  ;;  %1164 = vmatpush3.msra.mxu1 %v529_v38  ;;  %p1574_p10 = pnand %p1573_p2, %p1567_p9 }
  0x7a   : > { %1094 = vmatprep.subr.mxu0 %v1644_v0  ;;  %1165 = vmatprep.subr.mxu1 %v1644_v0 }
  0x7b   : > { %1095 = vmatpush3.msra.mxu0 %v362_v15  ;;  %1166 = vmatpush3.msra.mxu1 %v528_v39 }
  0x7c   : > { %1096 = vmatprep.subr.mxu0 %v1644_v0  ;;  %1167 = vmatprep.subr.mxu1 %v1644_v0 }
  0x7d   : > { %1097 = vmatpush3.msra.mxu0 %v361_v17  ;;  %1168 = vmatpush3.msra.mxu1 %v527_v40 }
  0x7e   : > { %1098 = vmatprep.subr.mxu0 %v1644_v0  ;;  %1169 = vmatprep.subr.mxu1 %v1644_v0 }
  0x7f   : > { %1099 = vmatpush3.msra.mxu0 %v360_v19  ;;  %1170 = vmatpush3.msra.mxu1 %v526_v41 }
  0x80   : > { %1100 = vmatprep.subr.mxu0 %v1644_v0  ;;  %1171 = vmatprep.subr.mxu1 %v1644_v0 }
  0x81   : > { %1101 = vmatpush3.msra.mxu0 %v359_v20  ;;  %1172 = vmatpush3.msra.mxu1 %v525_v42 }
  0x82   : > { %1102 = vmatprep.subr.mxu0 %v1644_v0  ;;  %1173 = vmatprep.subr.mxu1 %v1644_v0 }
  0x83   : > { %1103 = vmatpush3.msra.mxu0 %v358_v21  ;;  %1174 = vmatpush3.msra.mxu1 %v524_v43  ;;  %v696_v43 = vld [vmem:[#allocation8 + $0x40] sm:$0xff] }
  0x84   : > { %1104 = vmatprep.subr.mxu0 %v1644_v0  ;;  %1175 = vmatprep.subr.mxu1 %v1644_v0 }
  0x85   : > { %1105 = vmatpush3.msra.mxu0 %v357_v22  ;;  %1176 = vmatpush3.msra.mxu1 %v523_v44  ;;  %v695_v44 = vld [vmem:[#allocation8 + $0x38] sm:$0xff] }
  0x86   : > { %1106 = vmatprep.subr.mxu0 %v1644_v0  ;;  %1177 = vmatprep.subr.mxu1 %v1644_v0 }
  0x87   : > { %1107 = vmatpush3.msra.mxu0 %v356_v23  ;;  %1178 = vmatpush3.msra.mxu1 %v522_v45  ;;  %v694_v45 = vld [vmem:[#allocation8 + $0x30] sm:$0xff] }
  0x88   : > { %1109 = vmatmul.mubr.f32.vlgmr.msra.gmra.mxu0 %v343_v24  ;;  %1218 = vmatprep.subr.mxu0 %v1644_v0 }
  0x89   : > { %1111 = vmatprep.mubr.msk.f32.mxu0 %vm1645_vm0, %v1644_v0  ;;  %1289 = vmatprep.subr.mxu1 %v1644_v0 }
  0x8a   : > { %1219 = vmatpush3.msra.mxu0 %v703_v46 }
  0x8b   : > { %1220 = vmatprep.subr.mxu0 %v1644_v0 }
  0x8c   : > { %1112 = vmatmul.mubr.f32.gmra.mxu0 %v344_v25 }
  0x8d   : > { %1114 = vmatprep.mubr.msk.f32.mxu0 %vm1645_vm0, %v1644_v0  ;;  %1221 = vmatpush3.msra.mxu0 %v702_v47 }
  0x8e   : > { %1222 = vmatprep.subr.mxu0 %v1644_v0 }
  0x8f   : > { %1223 = vmatpush3.msra.mxu0 %v701_v48 }
  0x90   : > { %1115 = vmatmul.mubr.f32.gmra.mxu0 %v345_v26  ;;  %1224 = vmatprep.subr.mxu0 %v1644_v0 }
  0x91   : > { %1117 = vmatprep.mubr.msk.f32.mxu0 %vm1645_vm0, %v1644_v0  ;;  %1225 = vmatpush3.msra.mxu0 %v700_v49 }
  0x92   : > { %1226 = vmatprep.subr.mxu0 %v1644_v0 }
  0x93   : > { %1227 = vmatpush3.msra.mxu0 %v699_v50 }
  0x94   : > { %1118 = vmatmul.mubr.f32.gmra.mxu0 %v346_v27  ;;  %1228 = vmatprep.subr.mxu0 %v1644_v0 }
  0x95   : > { %1120 = vmatprep.mubr.msk.f32.mxu0 %vm1645_vm0, %v1644_v0  ;;  %1229 = vmatpush3.msra.mxu0 %v698_v51 }
  0x96   : > { %1230 = vmatprep.subr.mxu0 %v1644_v0 }
  0x97   : > { %1231 = vmatpush3.msra.mxu0 %v697_v52 }
  0x98   : > { %1121 = vmatmul.mubr.f32.gmra.mxu0 %v347_v28  ;;  %1232 = vmatprep.subr.mxu0 %v1644_v0 }
  0x99   : > { %1123 = vmatprep.mubr.msk.f32.mxu0 %vm1645_vm0, %v1644_v0  ;;  %1233 = vmatpush3.msra.mxu0 %v696_v43 }
  0x9a   : > { %1234 = vmatprep.subr.mxu0 %v1644_v0 }
  0x9b   : > { %1235 = vmatpush3.msra.mxu0 %v695_v44 }
  0x9c   : > { %1124 = vmatmul.mubr.f32.gmra.mxu0 %v348_v29  ;;  %1236 = vmatprep.subr.mxu0 %v1644_v0 }
  0x9d   : > { %1126 = vmatprep.mubr.msk.f32.mxu0 %vm1645_vm0, %v1644_v0  ;;  %1237 = vmatpush3.msra.mxu0 %v694_v45 }
  0x9e   : > { %1238 = vmatprep.subr.mxu0 %v1644_v0 }
  0xa0   : > { %1127 = vmatmul.mubr.f32.gmra.mxu0 %v349_v30 }
  0xa1   : > { %1129 = vmatprep.mubr.msk.f32.mxu0 %vm1645_vm0, %v1644_v0 }
  0xa4   : > { %1130 = vmatmul.mubr.f32.gmra.mxu0 %v350_v31 }
  0xa5   : > { %1132 = vmatprep.mubr.msk.f32.mxu0 %vm1645_vm0, %v1644_v0 }
  0xa8   : > { %1133 = vmatmul.mubr.f32.gmra.mxu0 %v351_v32 }
  0xa9   : > { %1135 = vmatprep.mubr.msk.f32.mxu0 %vm1645_vm0, %v1644_v0 }
  0xac   : > { %1136 = vmatmul.mubr.f32.gmra.mxu0 %v352_v33 }
  0xad   : > { %1138 = vmatprep.mubr.msk.f32.mxu0 %vm1645_vm0, %v1644_v0 }
  0xb0   : > { %1139 = vmatmul.mubr.f32.gmra.mxu0 %v353_v34 }
  0xb1   : > { %1141 = vmatprep.mubr.msk.f32.mxu0 %vm1645_vm0, %v1644_v0 }
  0xb4   : > { %1142 = vmatmul.mubr.f32.gmra.mxu0 %v354_v35 }
  0xb5   : > { %1144 = vmatprep.mubr.msk.f32.mxu0 %vm1645_vm0, %v1644_v0 }
  0xb8   : > { %1145 = vmatmul.mubr.f32.gmra.mxu0 %v355_v36 }
  0xb9   : > { %1250 = vmatprep.mubr.msk.f32.mxu0 %vm1645_vm0, %v1644_v0 }
 0x148   : > { %v445_v54 = vpop.f32.mrf.mxu0 }
 0x149   : > { %v446_v55 = vadd.f32 %v1943_v53, %v445_v54 }
 0x14a   : > { %v1110_v56 = vpop.f32.mrf.mxu0 }
 0x14b   : > { %1406 = vtanh.f32 %v446_v55 }
 0x14c   : > { %v450_v57 = vpop.f32.mrf.mxu0 }
 0x14d   : > { %v451_v58 = vadd.f32 %v1943_v53, %v450_v57 }
 0x14e   : > { %v1113_v59 = vpop.f32.mrf.mxu0 }
 0x14f   : > { %1408 = vtanh.f32 %v451_v58 }
 0x150   : > { %v455_v60 = vpop.f32.mrf.mxu0 }
 0x151   : > { %v456_v61 = vadd.f32 %v1943_v53, %v455_v60 }
 0x152   : > { %v1116_v62 = vpop.f32.mrf.mxu0 }
 0x153   : > { %1410 = vtanh.f32 %v456_v61 }
 0x154   : > { %v460_v63 = vpop.f32.mrf.mxu0 }
 0x155   : > { %v461_v1 = vadd.f32 %v1943_v53, %v460_v63 }
 0x156   : > { %v1119_v2 = vpop.f32.mrf.mxu0 }
 0x157   : > { %1412 = vtanh.f32 %v461_v1 }
 0x158   : > { %v1407_v3 = vpop.eup %1406  ;;  %v465_v4 = vpop.f32.mrf.mxu0 }
 0x159   : > { %v466_v5 = vadd.f32 %v1943_v53, %v465_v4  ;;  %1180 = vmatmul.mubr.f32.vlgmr.msra.gmra.mxu1 %v1407_v3 }
 0x15a   : > { %v1122_v6 = vpop.f32.mrf.mxu0  ;;  %1182 = vmatprep.mubr.msk.f32.mxu1 %vm1645_vm0, %v1644_v0  ;;  %1305 = vmatpush3.msra.mxu1 %v703_v46  ;;  %v693_v46 = vld [vmem:[#allocation8 + $0x28] sm:$0xff] }
 0x15b   : > { %1414 = vtanh.f32 %v466_v5  ;;  %1290 = vmatprep.subr.mxu1 %v1644_v0  ;;  %1239 = vmatpush3.msra.mxu0 %v693_v46 }
 0x15c   : > { %v1409_v7 = vpop.eup %1408  ;;  %v470_v8 = vpop.f32.mrf.mxu0  ;;  %1306 = vmatpush3.msra.mxu1 %v702_v47  ;;  %1240 = vmatprep.subr.mxu0 %v1644_v0  ;;  %v692_v47 = vld [vmem:[#allocation8 + $0x20] sm:$0xff] }
 0x15d   : > { %v471_v9 = vadd.f32 %v1943_v53, %v470_v8  ;;  %1183 = vmatmul.mubr.f32.gmra.mxu1 %v1409_v7  ;;  %1291 = vmatprep.subr.mxu1 %v1644_v0 }
 0x15e   : > { %v1125_v10 = vpop.f32.mrf.mxu0  ;;  %1185 = vmatprep.mubr.msk.f32.mxu1 %vm1645_vm0, %v1644_v0  ;;  %1307 = vmatpush3.msra.mxu1 %v701_v48  ;;  %v691_v48 = vld [vmem:[#allocation8 + $0x18] sm:$0xff] }
 0x15f   : > { %1416 = vtanh.f32 %v471_v9  ;;  %1292 = vmatprep.subr.mxu1 %v1644_v0  ;;  %1241 = vmatpush3.msra.mxu0 %v692_v47 }
 0x160   : > { %v1411_v11 = vpop.eup %1410  ;;  %v475_v12 = vpop.f32.mrf.mxu0  ;;  %1308 = vmatpush3.msra.mxu1 %v700_v49  ;;  %1242 = vmatprep.subr.mxu0 %v1644_v0  ;;  %v690_v49 = vld [vmem:[#allocation8 + $0x10] sm:$0xff] }
 0x161   : > { %v476_v13 = vadd.f32 %v1943_v53, %v475_v12  ;;  %1186 = vmatmul.mubr.f32.gmra.mxu1 %v1411_v11  ;;  %1293 = vmatprep.subr.mxu1 %v1644_v0 }
 0x162   : > { %v1128_v14 = vpop.f32.mrf.mxu0  ;;  %1188 = vmatprep.mubr.msk.f32.mxu1 %vm1645_vm0, %v1644_v0  ;;  %1309 = vmatpush3.msra.mxu1 %v699_v50  ;;  %v689_v50 = vld [vmem:[#allocation8 + $0x8] sm:$0xff] }
 0x163   : > { %1418 = vtanh.f32 %v476_v13  ;;  %1294 = vmatprep.subr.mxu1 %v1644_v0  ;;  %1243 = vmatpush3.msra.mxu0 %v691_v48 }
 0x164   : > { %v1413_v15 = vpop.eup %1412  ;;  %v480_v16 = vpop.f32.mrf.mxu0  ;;  %1310 = vmatpush3.msra.mxu1 %v698_v51  ;;  %1244 = vmatprep.subr.mxu0 %v1644_v0  ;;  %v688_v51 = vld [vmem:[#allocation8] sm:$0xff] }
 0x165   : > { %v481_v17 = vadd.f32 %v1943_v53, %v480_v16  ;;  %1189 = vmatmul.mubr.f32.gmra.mxu1 %v1413_v15  ;;  %1295 = vmatprep.subr.mxu1 %v1644_v0 }
 0x166   : > { %v1131_v18 = vpop.f32.mrf.mxu0  ;;  %1191 = vmatprep.mubr.msk.f32.mxu1 %vm1645_vm0, %v1644_v0  ;;  %1311 = vmatpush3.msra.mxu1 %v697_v52  ;;  %v2010_v52 = vld [vmem:[%s2121_s4] ss:$0 sm:$0xff] }
 0x167   : > { %1420 = vtanh.f32 %v481_v17  ;;  %1296 = vmatprep.subr.mxu1 %v1644_v0  ;;  %1245 = vmatpush3.msra.mxu0 %v690_v49 }
 0x168   : > { %v1415_v19 = vpop.eup %1414  ;;  %v485_v20 = vpop.f32.mrf.mxu0  ;;  %1312 = vmatpush3.msra.mxu1 %v696_v43  ;;  %1246 = vmatprep.subr.mxu0 %v1644_v0 }
 0x169   : > { %v486_v21 = vadd.f32 %v1943_v53, %v485_v20  ;;  %1192 = vmatmul.mubr.f32.gmra.mxu1 %v1415_v19  ;;  %1297 = vmatprep.subr.mxu1 %v1644_v0 }
 0x16a   : > { %v1134_v22 = vpop.f32.mrf.mxu0  ;;  %1194 = vmatprep.mubr.msk.f32.mxu1 %vm1645_vm0, %v1644_v0  ;;  %1313 = vmatpush3.msra.mxu1 %v695_v44 }
 0x16b   : > { %1422 = vtanh.f32 %v486_v21  ;;  %1298 = vmatprep.subr.mxu1 %v1644_v0  ;;  %1247 = vmatpush3.msra.mxu0 %v689_v50 }
 0x16c   : > { %v1417_v23 = vpop.eup %1416  ;;  %v490_v24 = vpop.f32.mrf.mxu0  ;;  %1314 = vmatpush3.msra.mxu1 %v694_v45  ;;  %1248 = vmatprep.subr.mxu0 %v1644_v0 }
 0x16d   : > { %v491_v25 = vadd.f32 %v1943_v53, %v490_v24  ;;  %1195 = vmatmul.mubr.f32.gmra.mxu1 %v1417_v23  ;;  %1299 = vmatprep.subr.mxu1 %v1644_v0 }
 0x16e   : > { %v1137_v26 = vpop.f32.mrf.mxu0  ;;  %1197 = vmatprep.mubr.msk.f32.mxu1 %vm1645_vm0, %v1644_v0  ;;  %1315 = vmatpush3.msra.mxu1 %v693_v46 }
 0x16f   : > { %1424 = vtanh.f32 %v491_v25  ;;  %1300 = vmatprep.subr.mxu1 %v1644_v0  ;;  %1249 = vmatpush3.msra.mxu0 %v688_v51 }
 0x170   : > { %v1419_v27 = vpop.eup %1418  ;;  %v495_v28 = vpop.f32.mrf.mxu0  ;;  %1316 = vmatpush3.msra.mxu1 %v692_v47 }
 0x171   : > { %v496_v29 = vadd.f32 %v1943_v53, %v495_v28  ;;  %1198 = vmatmul.mubr.f32.gmra.mxu1 %v1419_v27  ;;  %1301 = vmatprep.subr.mxu1 %v1644_v0 }
 0x172   : > { %v1140_v30 = vpop.f32.mrf.mxu0  ;;  %1200 = vmatprep.mubr.msk.f32.mxu1 %vm1645_vm0, %v1644_v0  ;;  %1317 = vmatpush3.msra.mxu1 %v691_v48 }
 0x173   : > { %1426 = vtanh.f32 %v496_v29  ;;  %1302 = vmatprep.subr.mxu1 %v1644_v0 }
 0x174   : > { %v1421_v31 = vpop.eup %1420  ;;  %v500_v32 = vpop.f32.mrf.mxu0  ;;  %1318 = vmatpush3.msra.mxu1 %v690_v49 }
 0x175   : > { %v501_v33 = vadd.f32 %v1943_v53, %v500_v32  ;;  %1201 = vmatmul.mubr.f32.gmra.mxu1 %v1421_v31  ;;  %1303 = vmatprep.subr.mxu1 %v1644_v0 }
 0x176   : > { %v1143_v34 = vpop.f32.mrf.mxu0  ;;  %1203 = vmatprep.mubr.msk.f32.mxu1 %vm1645_vm0, %v1644_v0  ;;  %1319 = vmatpush3.msra.mxu1 %v689_v50 }
 0x177   : > { %1428 = vtanh.f32 %v501_v33  ;;  %1304 = vmatprep.subr.mxu1 %v1644_v0 }
 0x178   : > { %v1423_v35 = vpop.eup %1422  ;;  %v505_v36 = vpop.f32.mrf.mxu0  ;;  %1320 = vmatpush3.msra.mxu1 %v688_v51 }
 0x179   : > { %v506_v37 = vadd.f32 %v1943_v53, %v505_v36  ;;  %1204 = vmatmul.mubr.f32.gmra.mxu1 %v1423_v35 }
 0x17a   : > { %v1146_v38 = vpop.f32.mrf.mxu0  ;;  %1206 = vmatprep.mubr.msk.f32.mxu1 %vm1645_vm0, %v1644_v0 }
 0x17b   : > { %1430 = vtanh.f32 %v506_v37 }
 0x17c   : > { %v1425_v39 = vpop.eup %1424 }
 0x17d   : > { %1207 = vmatmul.mubr.f32.gmra.mxu1 %v1425_v39 }
 0x17e   : > { %1209 = vmatprep.mubr.msk.f32.mxu1 %vm1645_vm0, %v1644_v0 }
 0x180   : > { %v1427_v40 = vpop.eup %1426 }
 0x181   : > { %1210 = vmatmul.mubr.f32.gmra.mxu1 %v1427_v40 }
 0x182   : > { %1212 = vmatprep.mubr.msk.f32.mxu1 %vm1645_vm0, %v1644_v0 }
 0x184   : > { %v1429_v41 = vpop.eup %1428 }
 0x185   : > { %1213 = vmatmul.mubr.f32.gmra.mxu1 %v1429_v41 }
 0x186   : > { %1215 = vmatprep.mubr.msk.f32.mxu1 %vm1645_vm0, %v1644_v0 }
 0x188   : > { %v1431_v42 = vpop.eup %1430 }
 0x189   : > { %1216 = vmatmul.mubr.f32.gmra.mxu1 %v1431_v42  ;;  %v983_v42 = vld [vmem:[%s2123_s6] ss:$0 sm:$0xff] }
 0x18a   : > { %1271 = vmatprep.mubr.msk.f32.mxu1 %vm1645_vm0, %v1644_v0 }
 0x219   : > { %v611_v53 = vpop.f32.mrf.mxu1 }
 0x21a   : > { %v612_v54 = vadd.f32 %v2010_v52, %v611_v53 }
 0x21b   : > { %v1181_v55 = vpop.f32.mrf.mxu1 }
 0x21c   : > { %1432 = vtanh.f32 %v612_v54 }
 0x21d   : > { %v616_v56 = vpop.f32.mrf.mxu1 }
 0x21e   : > { %v617_v57 = vadd.f32 %v2010_v52, %v616_v56 }
 0x21f   : > { %v1184_v58 = vpop.f32.mrf.mxu1 }
 0x220   : > { %1434 = vtanh.f32 %v617_v57 }
 0x221   : > { %v621_v59 = vpop.f32.mrf.mxu1 }
 0x222   : > { %v622_v60 = vadd.f32 %v2010_v52, %v621_v59 }
 0x223   : > { %v1187_v61 = vpop.f32.mrf.mxu1 }
 0x224   : > { %1436 = vtanh.f32 %v622_v60 }
 0x225   : > { %v626_v62 = vpop.f32.mrf.mxu1 }
 0x226   : > { %v627_v63 = vadd.f32 %v2010_v52, %v626_v62 }
 0x227   : > { %v1190_v1 = vpop.f32.mrf.mxu1 }
 0x228   : > { %1438 = vtanh.f32 %v627_v63 }
 0x229   : > { %v1433_v2 = vpop.eup %1432  ;;  %v631_v3 = vpop.f32.mrf.mxu1 }
 0x22a   : > { %v632_v4 = vadd.f32 %v2010_v52, %v631_v3  ;;  %1251 = vmatmul.mubr.f32.vlgmr.msra.gmra.mxu0 %v1433_v2 }
 0x22b   : > { %v1193_v5 = vpop.f32.mrf.mxu1  ;;  %1253 = vmatprep.mubr.msk.f32.mxu0 %vm1645_vm0, %v1644_v0 }
 0x22c   : > { %1440 = vtanh.f32 %v632_v4 }
 0x22d   : > { %v1435_v6 = vpop.eup %1434  ;;  %v636_v7 = vpop.f32.mrf.mxu1 }
 0x22e   : > { %v637_v8 = vadd.f32 %v2010_v52, %v636_v7  ;;  %1254 = vmatmul.mubr.f32.gmra.mxu0 %v1435_v6 }
 0x22f   : > { %v1196_v9 = vpop.f32.mrf.mxu1  ;;  %1256 = vmatprep.mubr.msk.f32.mxu0 %vm1645_vm0, %v1644_v0 }
 0x230   : > { %1442 = vtanh.f32 %v637_v8 }
 0x231   : > { %v1437_v10 = vpop.eup %1436  ;;  %v641_v11 = vpop.f32.mrf.mxu1 }
 0x232   : > { %v642_v12 = vadd.f32 %v2010_v52, %v641_v11  ;;  %1257 = vmatmul.mubr.f32.gmra.mxu0 %v1437_v10 }
 0x233   : > { %v1199_v13 = vpop.f32.mrf.mxu1  ;;  %1259 = vmatprep.mubr.msk.f32.mxu0 %vm1645_vm0, %v1644_v0 }
 0x234   : > { %1444 = vtanh.f32 %v642_v12 }
 0x235   : > { %v1439_v14 = vpop.eup %1438  ;;  %v646_v15 = vpop.f32.mrf.mxu1 }
 0x236   : > { %v647_v16 = vadd.f32 %v2010_v52, %v646_v15  ;;  %1260 = vmatmul.mubr.f32.gmra.mxu0 %v1439_v14 }
 0x237   : > { %v1202_v17 = vpop.f32.mrf.mxu1  ;;  %1262 = vmatprep.mubr.msk.f32.mxu0 %vm1645_vm0, %v1644_v0 }
 0x238   : > { %1446 = vtanh.f32 %v647_v16 }
 0x239   : > { %v1441_v18 = vpop.eup %1440  ;;  %v651_v19 = vpop.f32.mrf.mxu1 }
 0x23a   : > { %v652_v20 = vadd.f32 %v2010_v52, %v651_v19  ;;  %1263 = vmatmul.mubr.f32.gmra.mxu0 %v1441_v18 }
 0x23b   : > { %v1205_v21 = vpop.f32.mrf.mxu1  ;;  %1265 = vmatprep.mubr.msk.f32.mxu0 %vm1645_vm0, %v1644_v0 }
 0x23c   : > { %1448 = vtanh.f32 %v652_v20 }
 0x23d   : > { %v1443_v22 = vpop.eup %1442  ;;  %v656_v23 = vpop.f32.mrf.mxu1 }
 0x23e   : > { %v657_v24 = vadd.f32 %v2010_v52, %v656_v23  ;;  %1266 = vmatmul.mubr.f32.gmra.mxu0 %v1443_v22 }
 0x23f   : > { %v1208_v25 = vpop.f32.mrf.mxu1  ;;  %1268 = vmatprep.mubr.msk.f32.mxu0 %vm1645_vm0, %v1644_v0 }
 0x240   : > { %1450 = vtanh.f32 %v657_v24 }
 0x241   : > { %v1445_v26 = vpop.eup %1444  ;;  %v661_v27 = vpop.f32.mrf.mxu1 }
 0x242   : > { %v662_v28 = vadd.f32 %v2010_v52, %v661_v27  ;;  %1269 = vmatmul.mubr.f32.gmra.mxu0 %v1445_v26 }
 0x243   : > { %v1211_v29 = vpop.f32.mrf.mxu1 }
 0x244   : > { %1452 = vtanh.f32 %v662_v28 }
 0x245   : > { %v1447_v30 = vpop.eup %1446  ;;  %v666_v31 = vpop.f32.mrf.mxu1 }
 0x246   : > { %v667_v32 = vadd.f32 %v2010_v52, %v666_v31  ;;  %1272 = vmatmul.mubr.f32.vlgmr.msra.gmra.mxu1 %v1447_v30 }
 0x247   : > { %v1214_v33 = vpop.f32.mrf.mxu1  ;;  %1274 = vmatprep.mubr.msk.f32.mxu1 %vm1645_vm0, %v1644_v0 }
 0x248   : > { %1454 = vtanh.f32 %v667_v32 }
 0x249   : > { %v1449_v34 = vpop.eup %1448  ;;  %v671_v35 = vpop.f32.mrf.mxu1 }
 0x24a   : > { %v672_v36 = vadd.f32 %v2010_v52, %v671_v35  ;;  %1275 = vmatmul.mubr.f32.gmra.mxu1 %v1449_v34 }
 0x24b   : > { %v1217_v37 = vpop.f32.mrf.mxu1  ;;  %1277 = vmatprep.mubr.msk.f32.mxu1 %vm1645_vm0, %v1644_v0 }
 0x24c   : > { %1456 = vtanh.f32 %v672_v36 }
 0x24d   : > { %v1451_v38 = vpop.eup %1450 }
 0x24e   : > { %1278 = vmatmul.mubr.f32.gmra.mxu1 %v1451_v38 }
 0x24f   : > { %1280 = vmatprep.mubr.msk.f32.mxu1 %vm1645_vm0, %v1644_v0 }
 0x251   : > { %v1453_v39 = vpop.eup %1452 }
 0x252   : > { %1281 = vmatmul.mubr.f32.gmra.mxu1 %v1453_v39 }
 0x253   : > { %1283 = vmatprep.mubr.msk.f32.mxu1 %vm1645_vm0, %v1644_v0 }
 0x255   : > { %v1455_v40 = vpop.eup %1454 }
 0x256   : > { %1284 = vmatmul.mubr.f32.gmra.mxu1 %v1455_v40 }
 0x257   : > { %1286 = vmatprep.mubr.msk.f32.mxu1 %vm1645_vm0, %v1644_v0 }
 0x259   : > { %v1457_v41 = vpop.eup %1456 }
 0x25a   : > { %1287 = vmatmul.mubr.f32.gmra.mxu1 %v1457_v41 }
 0x2ea   : > { %v777_v43 = vpop.f32.mrf.mxu0 }
 0x2eb   : > { %v778_v44 = vadd.f32 %v983_v42, %v777_v43 }
 0x2ec   : > { %v1252_v45 = vpop.f32.mrf.mxu0 }
 0x2ed   : > { %841 = vst [vmem:[%s2052_s16] sm:$0xff] %v778_v44 }
 0x2ee   : > { %v782_v46 = vpop.f32.mrf.mxu0 }
 0x2ef   : > { %v783_v0 = vadd.f32 %v983_v42, %v782_v46 }
 0x2f0   : > { %v1255_v47 = vpop.f32.mrf.mxu0 }
 0x2f1   : > { %842 = vst [vmem:[%s2052_s16 + $0x8] sm:$0xff] %v783_v0 }
 0x2f2   : > { %v787_v48 = vpop.f32.mrf.mxu0 }
 0x2f3   : > { %v788_v49 = vadd.f32 %v983_v42, %v787_v48 }
 0x2f4   : > { %v1258_v50 = vpop.f32.mrf.mxu0 }
 0x2f5   : > { %843 = vst [vmem:[%s2052_s16 + $0x10] sm:$0xff] %v788_v49 }
 0x2f6   : > { %v792_v51 = vpop.f32.mrf.mxu0 }
 0x2f7   : > { %v793_v52 = vadd.f32 %v983_v42, %v792_v51 }
 0x2f8   : > { %v1261_v53 = vpop.f32.mrf.mxu0 }
 0x2f9   : > { %844 = vst [vmem:[%s2052_s16 + $0x18] sm:$0xff] %v793_v52 }
 0x2fa   : > { %v797_v54 = vpop.f32.mrf.mxu0 }
 0x2fb   : > { %v798_v55 = vadd.f32 %v983_v42, %v797_v54 }
 0x2fc   : > { %v1264_v56 = vpop.f32.mrf.mxu0 }
 0x2fd   : > { %845 = vst [vmem:[%s2052_s16 + $0x20] sm:$0xff] %v798_v55 }
 0x2fe   : > { %v802_v57 = vpop.f32.mrf.mxu0 }
 0x2ff   : > { %v803_v58 = vadd.f32 %v983_v42, %v802_v57 }
 0x300   : > { %v1267_v59 = vpop.f32.mrf.mxu0 }
 0x301   : > { %846 = vst [vmem:[%s2052_s16 + $0x28] sm:$0xff] %v803_v58 }
 0x302   : > { %v807_v60 = vpop.f32.mrf.mxu0 }
 0x303   : > { %v808_v61 = vadd.f32 %v983_v42, %v807_v60 }
 0x304   : > { %v1270_v62 = vpop.f32.mrf.mxu0 }
 0x305   : > { %847 = vst [vmem:[%s2052_s16 + $0x30] sm:$0xff] %v808_v61 }
 0x306   : > { %v812_v63 = vpop.f32.mrf.mxu1 }
 0x307   : > { %v813_v1 = vadd.f32 %v983_v42, %v812_v63 }
 0x308   : > { %v1273_v2 = vpop.f32.mrf.mxu1 }
 0x309   : > { %848 = vst [vmem:[%s2052_s16 + $0x38] sm:$0xff] %v813_v1 }
 0x30a   : > { %v817_v3 = vpop.f32.mrf.mxu1 }
 0x30b   : > { %v818_v4 = vadd.f32 %v983_v42, %v817_v3 }
 0x30c   : > { %v1276_v5 = vpop.f32.mrf.mxu1 }
 0x30d   : > { %849 = vst [vmem:[%s2052_s16 + $0x40] sm:$0xff] %v818_v4 }
 0x30e   : > { %v822_v6 = vpop.f32.mrf.mxu1 }
 0x30f   : > { %v823_v7 = vadd.f32 %v983_v42, %v822_v6 }
 0x310   : > { %v1279_v8 = vpop.f32.mrf.mxu1 }
 0x311   : > { %850 = vst [vmem:[%s2052_s16 + $0x48] sm:$0xff] %v823_v7 }
 0x312   : > { %v827_v9 = vpop.f32.mrf.mxu1 }
 0x313   : > { %v828_v10 = vadd.f32 %v983_v42, %v827_v9 }
 0x314   : > { %v1282_v11 = vpop.f32.mrf.mxu1 }
 0x315   : > { %851 = vst [vmem:[%s2052_s16 + $0x50] sm:$0xff] %v828_v10 }
 0x316   : > { %v832_v12 = vpop.f32.mrf.mxu1 }
 0x317   : > { %v833_v13 = vadd.f32 %v983_v42, %v832_v12 }
 0x318   : > { %v1285_v14 = vpop.f32.mrf.mxu1 }
 0x319   : > { %852 = vst [vmem:[%s2052_s16 + $0x58] sm:$0xff] %v833_v13 }
 0x31a   : > { %v837_v15 = vpop.f32.mrf.mxu1 }
 0x31b   : > { %v838_v16 = vadd.f32 %v983_v42, %v837_v15 }
 0x31c   : > { %v1288_v17 = vpop.f32.mrf.mxu1 }
 0x31d   : > { %853 = vst [vmem:[%s2052_s16 + $0x60] sm:$0xff] %v838_v16 }
 0x31e   : > { %1577 = shalt.err (!%p1574_p10)
}
 0x31f   : > { %s1578_s11 = scalar_lea.hbm %s2071_s22, 1664  ;;  %s1582_s21 = scalar_lea.hbm %s2124_s7, 3328 }
 0x320   : > { %p1579_p6 = scmp.ne.s32.totalorder %s2071_s22, %s1578_s11  ;;  %p1583_p3 = scmp.lt.s32.totalorder %s2071_s22, %s2124_s7 }
 0x321   : > { %p1584_p11 = scmp.lt.s32.totalorder %s1582_s21, %s1578_s11 }
 0x322   : > { %p1580_p4 = pnand %p1579_p6, %p2147_p1 }
 0x323   : > { %p1585_p5 = por %p1584_p11, %p1583_p3 }
 0x324   : > { %p1581_p8 = pneg %p1580_p4 }
 0x326   : > { %p1586_p7 = pnand %p1585_p5, %p1581_p8 }
 0x328   : > { %1589 = shalt.err (!%p1586_p7)
}
 0x329   : > { %s1647_s1 = smov 128   ;;  %s1648_s18 = smov 8  }
 0x32a   : > { %1337 = dma.vmem_to_hbm [thread:$0]  (%p2147_p1), %s2073_s19, 1664, %s2071_s22, %s855_s10, %s1647_s1, %s1647_s1, %s1648_s18  }
 0x32b PF: > { %s883_s28 = sand.u32 1, %s1624_s24   ;;  %p2148_p12 = scmp.ne.s32.totalorder %s2133_s8, 0 }
 0x32c   : > { %p2149_p9 = scmp.ge.s32.totalorder %s1636_s27, 2  ;;  %s884_s23 = scalar_lea.sflag [#allocation4], %s883_s28 }
 0x32e   : > { %p1354_p13 = pnand %p2149_p9, %p2148_p12 }
 0x330   : > { %p1355_p0 = pneg %p1354_p13 }
 0x332   : > { %1619 = dma.done.wait (%p1355_p0), %s884_s23, 1664  }
 0x333   : > { %1621 = vsyncadd (%p1355_p0), %s884_s23, 4294965632  ;;  %p22_p2 = scmp.ge.s32.totalorder %s1778_s14, 4   ;;  %s2150_s24 = smov %s1628_s25 }
 0x334   : > { %s2151_s25 = smov %s1632_s26  ;;  %s2152_s26 = smov %s1788_s17 }
 0x335   : > { %s2153_s27 = smov %s1778_s14  ;;  %24 = sbr.rel (!%p22_p2) target bundleno = 9 (0x9), region = 105 }
 0x33a   :  { %889 = vsyncpa [#allocation3], 1 }
 0x33b   :  { %891 = vsyncpa [#allocation3 + $0x1], 1 }
 0x33c   :  { %892 = vsyncpa [#allocation6], 1 }
 0x33d   :  { %893 = vsyncpa [#allocation9], 1 }
 0x33e   :  { %894 = vsyncpa [#allocation4], 1 }
 0x33f   :  { %896 = vsyncpa [#allocation4 + $0x1], 1 }

</bundles_post_ra>
